<compile_context>
chip_gen: v7x
topology: tpu7x:2x2x1
jax: 0.10.0
libtpu: 0.0.40
codegen_flags: <defaults>
</compile_context>

<pallas_src>
import jax
import jax.numpy as jnp
from jax.experimental import pallas as pl
from jax.experimental.pallas import tpu as pltpu


def _make_silu_chain_kernel(io_dtype):
    low_prec_tanh = jnp.dtype(io_dtype) in (
        jnp.dtype(jnp.bfloat16),
        jnp.dtype(jnp.float16),
    )

    def kernel(x_ref, o_ref):
        x = x_ref[...].astype(jnp.float32)
        # SiLU(x) = x * sigmoid(x) = t * (tanh(t) + 1),  t = x/2.
        for _ in range(4):
            t = 0.5 * x
            if low_prec_tanh:
                # Halve EUP pressure (matters on v7x); multiplies stay f32.
                th = jnp.tanh(t.astype(jnp.bfloat16)).astype(jnp.float32)
            else:
                th = jnp.tanh(t)
            x = t * (th + 1.0)
        o_ref[...] = x.astype(o_ref.dtype)

    return kernel


def _min_sublanes(dtype):
    bits = jnp.dtype(dtype).itemsize * 8
    if bits >= 32:
        return 8
    if bits == 16:
        return 16
    return 32


def _choose_cols(total, min_rows):
    """Widest lane-dense width (multiple of 128, <= 2048) dividing `total`,
    preferring a choice that leaves >= min_rows rows (full vreg occupancy)."""
    candidates = (2048, 1024, 512, 256, 128)
    for c in candidates:
        if total % c == 0 and total // c >= min_rows:
            return c
    for c in candidates:
        if total % c == 0:
            return c
    return None


def _target_block_bytes():
    """Per-block I/O-dtype bytes: bigger on 128 MiB-VMEM chips (v5e/v6e),
    conservative on v7x's 64 MiB VMEM."""
    try:
        vmem = pltpu.get_tpu_info().vmem_capacity_bytes
    except Exception:
        vmem = 64 << 20
    if vmem >= (100 << 20):
        return 8 << 20
    return 6 << 20


def _silu_chain_bulk(flat, dtype):
    """Kernel path for a flat array whose length is a multiple of 128."""
    total = flat.shape[0]
    itemsize = jnp.dtype(dtype).itemsize
    min_sub = _min_sublanes(dtype)

    cols = _choose_cols(total, min_sub)
    rows = total // cols
    x2d = flat.reshape(rows, cols)

    # Row tile sized for large blocks (amortize per-step overhead), rounded
    # to the dtype's minimum sublane tile.
    target_rows = max(min_sub, _target_block_bytes() // (cols * itemsize))
    if rows <= target_rows:
        tr = rows  # full extent: single block, always a legal block shape
    else:
        tr = max(min_sub, (target_rows // min_sub) * min_sub)
    grid = (pl.cdiv(rows, tr),)

    block_bytes = tr * cols * itemsize
    # in + out, double-buffered, plus headroom for in-kernel f32 temporaries.
    vmem_limit = min(4 * block_bytes + (8 << 20), 96 << 20)

    cost = pl.CostEstimate(
        flops=12 * total,             # 3 VALU ops/layer * 4 layers
        transcendentals=4 * total,    # 1 tanh/layer * 4 layers
        bytes_accessed=2 * total * itemsize,
    )

    out = pl.pallas_call(
        _make_silu_chain_kernel(dtype),
        out_shape=jax.ShapeDtypeStruct((rows, cols), dtype),
        grid_spec=pltpu.PrefetchScalarGridSpec(
            num_scalar_prefetch=0,
            grid=grid,
            in_specs=[pl.BlockSpec((tr, cols), lambda i: (i, 0))],
            out_specs=pl.BlockSpec((tr, cols), lambda i: (i, 0)),
        ),
        compiler_params=pltpu.CompilerParams(
            dimension_semantics=("parallel",),  # shard blocks across TCs
            vmem_limit_bytes=int(vmem_limit),
        ),
        cost_estimate=cost,
    )(x2d)

    return out.reshape(-1)


def _silu_chain_jnp(flat):
    y = flat.astype(jnp.float32)
    for _ in range(4):
        y = y * jax.nn.sigmoid(y)
    return y.astype(flat.dtype)


def silu_chain(x):
    """Applies SiLU four times elementwise (matches the module's forward)."""
    orig_shape = x.shape
    dtype = x.dtype
    total = x.size
    flat = x.reshape(-1)

    tail_len = total % 128
    bulk_len = total - tail_len

    if bulk_len == 0:
        return _silu_chain_jnp(flat).reshape(orig_shape)

    if tail_len == 0:
        out_flat = _silu_chain_bulk(flat, dtype)
    else:
        # TODO(synk): bulk/tail split adds one slice + one concat pass for
        # non-128-divisible sizes; still cheaper than the old pad+slice path.
        bulk_out = _silu_chain_bulk(flat[:bulk_len], dtype)
        tail_out = _silu_chain_jnp(flat[bulk_len:])
        out_flat = jnp.concatenate([bulk_out, tail_out])

    return out_flat.reshape(orig_shape)


def silu_chain_ref(x):
    y = x.astype(jnp.float32)
    for _ in range(4):
        y = y * jax.nn.sigmoid(y)
    return y.astype(x.dtype)


if __name__ == "__main__":
    key = jax.random.PRNGKey(0)
    # NCHW input, consistent with a conv-style module.
    x = jax.random.normal(key, (2, 4, 16, 16), dtype=jnp.float32)

    y = silu_chain(x)
    jax.block_until_ready(y)

    y_ref = silu_chain_ref(x)
    assert y.shape == x.shape and y.dtype == x.dtype
    assert jnp.allclose(y, y_ref, atol=1e-5, rtol=1e-5), "mismatch vs reference"

    print("KERNEL_OK")
</pallas_src>

<mosaic_0001>
module attributes {stable_mosaic.version = 11 : i64} {
  func.func @kernel(%arg0: i32, %arg1: memref<8x256xf32, #tpu.memory_space<vmem>>, %arg2: memref<8x256xf32, #tpu.memory_space<vmem>>) attributes {dimension_semantics = [#tpu.dimension_semantics<parallel>], iteration_bounds = array<i64: 1>, scalar_prefetch = 0 : i64, scratch_operands = 0 : i64, tpu.core_type = #tpu.core_type<tc>, window_params = [{transform_indices = @transform_0, window_bounds = array<i64: 8, 256>}, {transform_indices = @transform_1, window_bounds = array<i64: 8, 256>}]} {
    %c0 = arith.constant 0 : index
    %c0_0 = arith.constant 0 : index
    %0 = vector.load %arg1[%c0, %c0_0] : memref<8x256xf32, #tpu.memory_space<vmem>>, vector<8x256xf32>
    %cst = arith.constant 5.000000e-01 : f32
    %1 = vector.broadcast %cst : f32 to vector<8x256xf32>
    %2 = arith.mulf %1, %0 : vector<8x256xf32>
    %3 = math.tanh %2 : vector<8x256xf32>
    %cst_1 = arith.constant 1.000000e+00 : f32
    %4 = vector.broadcast %cst_1 : f32 to vector<8x256xf32>
    %5 = arith.addf %3, %4 : vector<8x256xf32>
    %6 = arith.mulf %2, %5 : vector<8x256xf32>
    %cst_2 = arith.constant 5.000000e-01 : f32
    %7 = vector.broadcast %cst_2 : f32 to vector<8x256xf32>
    %8 = arith.mulf %7, %6 : vector<8x256xf32>
    %9 = math.tanh %8 : vector<8x256xf32>
    %cst_3 = arith.constant 1.000000e+00 : f32
    %10 = vector.broadcast %cst_3 : f32 to vector<8x256xf32>
    %11 = arith.addf %9, %10 : vector<8x256xf32>
    %12 = arith.mulf %8, %11 : vector<8x256xf32>
    %cst_4 = arith.constant 5.000000e-01 : f32
    %13 = vector.broadcast %cst_4 : f32 to vector<8x256xf32>
    %14 = arith.mulf %13, %12 : vector<8x256xf32>
    %15 = math.tanh %14 : vector<8x256xf32>
    %cst_5 = arith.constant 1.000000e+00 : f32
    %16 = vector.broadcast %cst_5 : f32 to vector<8x256xf32>
    %17 = arith.addf %15, %16 : vector<8x256xf32>
    %18 = arith.mulf %14, %17 : vector<8x256xf32>
    %cst_6 = arith.constant 5.000000e-01 : f32
    %19 = vector.broadcast %cst_6 : f32 to vector<8x256xf32>
    %20 = arith.mulf %19, %18 : vector<8x256xf32>
    %21 = math.tanh %20 : vector<8x256xf32>
    %cst_7 = arith.constant 1.000000e+00 : f32
    %22 = vector.broadcast %cst_7 : f32 to vector<8x256xf32>
    %23 = arith.addf %21, %22 : vector<8x256xf32>
    %24 = arith.mulf %20, %23 : vector<8x256xf32>
    %c0_8 = arith.constant 0 : index
    %c0_9 = arith.constant 0 : index
    %25 = vector.load %arg2[%c0_8, %c0_9] : memref<8x256xf32, #tpu.memory_space<vmem>>, vector<8x256xf32>
    tpu.vector_store %arg2[%c0_8, %c0_9], %24 {strides = array<i32>} : memref<8x256xf32, #tpu.memory_space<vmem>>, vector<8x256xf32>,
    return
  }
  func.func @transform_0(%arg0: i32) -> (i32, i32) {
    %c0_i32 = arith.constant 0 : i32
    %c0_i32_0 = arith.constant 0 : i32
    return %arg0, %c0_i32 : i32, i32
  }
  func.func @transform_1(%arg0: i32) -> (i32, i32) {
    %c0_i32 = arith.constant 0 : i32
    %c0_i32_0 = arith.constant 0 : i32
    return %arg0, %c0_i32 : i32, i32
  }
}

</mosaic_0001>

<bundles_post_ra>
// kernel: tpu_custom_call.1
= control target key start
LH: loop header
LB: loop body
LE: loop exit
PB: predicated region body
PF: predicated region fallthrough
CT: control target
= control target key end

     0   :  { %6 = vsyncpa [#allocation3], 0  ;;  %s174_s0 = inlined_call_operand.hbm [shape: f32[8,256], index: 0, kind: input, shape index: {}]   ;;  %s175_s1 = inlined_call_operand.hbm [shape: f32[8,256], index: 1, kind: output, shape index: {}]  }
   0x1   :  { %7 = vsyncpa [#allocation4], 0  ;;  %s138_s6 = smov [#allocation2]   ;;  %s90_s10 = scalar_lea.hbm %s174_s0, 256 }
   0x2   :  { %s14_s7 = sshll.u32 %s138_s6, 4  ;;  %p91_p0 = scmp.ne.s32.totalorder %s174_s0, %s90_s10  ;;  %s15_s7 = int_to_ptr.vmem [resolvable:$true] %s14_s7 }
   0x3   :  { %p94_p1 = scmp.lt.u32.totalorder %s90_s10, %s174_s0 }
   0x5   :  { %p96_p2 = pnand %p94_p1, %p91_p0 }
   0x7   :  { %99 = shalt.err (!%p96_p2)
}
   0x8   :  { %s100_s15 = scalar_lea.vmem %s15_s7, 256  ;;  %p105_p4 = scmp.lt.s32.totalorder %s15_s7, %s15_s7 }
   0x9   :  { %p101_p3 = scmp.ne.s32.totalorder %s15_s7, %s100_s15  ;;  %p106_p5 = scmp.lt.s32.totalorder %s100_s15, %s100_s15 }
   0xb   :  { %p107_p6 = por %p106_p5, %p105_p4 }
   0xd   :  { %p108_p7 = pnand %p107_p6, %p101_p3 }
   0xf   :  { %111 = shalt.err (!%p108_p7)
}
  0x10   :  { %17 = dma.hbm_to_vmem [thread:$0]  %s174_s0, 256, %s15_s7, [#allocation3]  }
  0x11   :  { %134 = dma.done.wait [#allocation3], 256  }
  0x12   :  { %135 = vsyncadd [#allocation3], 4294967040  ;;  %v21_v0 = vld [vmem:[#allocation2] sm:$0xff]  ;;  %v22_v1 = vld [vmem:[#allocation2 + $0x8] sm:$0xff]  ;;  %s139_s0 = smov [#allocation5]  }
  0x13   :  { %v23_v2 = vmul.f32 0.5, %v21_v0  ;;  %v24_v3 = vmul.f32 0.5, %v22_v1  ;;  %s63_s18 = sshll.u32 %s139_s0, 4  ;;  %s64_s18 = int_to_ptr.vmem [resolvable:$true] %s63_s18 }
  0x14   :  { %s112_s19 = scalar_lea.vmem %s64_s18, 256  ;;  %p117_p9 = scmp.lt.s32.totalorder %s64_s18, %s64_s18 }
  0x15   :  { %74 = vtanh.f32 %v23_v2  ;;  %p113_p8 = scmp.ne.s32.totalorder %s64_s18, %s112_s19  ;;  %p118_p10 = scmp.lt.s32.totalorder %s112_s19, %s112_s19 }
  0x16   :  { %76 = vtanh.f32 %v24_v3 }
  0x17   :  { %p119_p11 = por %p118_p10, %p117_p9 }
  0x19   :  { %p120_p12 = pnand %p119_p11, %p113_p8 }
  0x1f   :  { %v75_v4 = vpop.eup %74 }
  0x20   :  { %v77_v5 = vpop.eup %76  ;;  %v27_v6 = vadd.f32 1.0, %v75_v4 }
  0x21   :  { %v28_v7 = vadd.f32 1.0, %v77_v5 }
  0x22   :  { %v29_v8 = vmul.f32 %v27_v6, %v23_v2 }
  0x23   :  { %v30_v9 = vmul.f32 %v28_v7, %v24_v3 }
  0x24   :  { %v31_v10 = vmul.f32 0.5, %v29_v8 }
  0x25   :  { %v32_v11 = vmul.f32 0.5, %v30_v9 }
  0x26   :  { %78 = vtanh.f32 %v31_v10 }
  0x27   :  { %80 = vtanh.f32 %v32_v11 }
  0x30   :  { %v79_v12 = vpop.eup %78 }
  0x31   :  { %v81_v13 = vpop.eup %80  ;;  %v35_v14 = vadd.f32 1.0, %v79_v12 }
  0x32   :  { %v36_v15 = vadd.f32 1.0, %v81_v13 }
  0x33   :  { %v37_v16 = vmul.f32 %v35_v14, %v31_v10 }
  0x34   :  { %v38_v17 = vmul.f32 %v36_v15, %v32_v11 }
  0x35   :  { %v39_v18 = vmul.f32 0.5, %v37_v16 }
  0x36   :  { %v40_v19 = vmul.f32 0.5, %v38_v17 }
  0x37   :  { %82 = vtanh.f32 %v39_v18 }
  0x38   :  { %84 = vtanh.f32 %v40_v19 }
  0x41   :  { %v83_v20 = vpop.eup %82 }
  0x42   :  { %v85_v21 = vpop.eup %84  ;;  %v43_v22 = vadd.f32 1.0, %v83_v20 }
  0x43   :  { %v44_v23 = vadd.f32 1.0, %v85_v21 }
  0x44   :  { %v45_v24 = vmul.f32 %v43_v22, %v39_v18 }
  0x45   :  { %v46_v25 = vmul.f32 %v44_v23, %v40_v19 }
  0x46   :  { %v47_v26 = vmul.f32 0.5, %v45_v24 }
  0x47   :  { %v48_v27 = vmul.f32 0.5, %v46_v25 }
  0x48   :  { %86 = vtanh.f32 %v47_v26 }
  0x49   :  { %88 = vtanh.f32 %v48_v27 }
  0x52   :  { %v87_v28 = vpop.eup %86 }
  0x53   :  { %v89_v29 = vpop.eup %88  ;;  %v51_v30 = vadd.f32 1.0, %v87_v28 }
  0x54   :  { %v52_v31 = vadd.f32 1.0, %v89_v29 }
  0x55   :  { %v53_v32 = vmul.f32 %v51_v30, %v47_v26 }
  0x56   :  { %v54_v33 = vmul.f32 %v52_v31, %v48_v27 }
  0x57   :  { %55 = vst [vmem:[#allocation5] sm:$0xff] %v53_v32 }
  0x58   :  { %56 = vst [vmem:[#allocation5 + $0x8] sm:$0xff] %v54_v33 }
  0x59   :  { %123 = shalt.err (!%p120_p12)
}
  0x5a   :  { %s124_s22 = scalar_lea.hbm %s175_s1, 256 }
  0x5b   :  { %p125_p13 = scmp.ne.s32.totalorder %s175_s1, %s124_s22  ;;  %p128_p0 = scmp.lt.u32.totalorder %s124_s22, %s175_s1 }
  0x5d   :  { %p130_p1 = pnand %p128_p0, %p125_p13 }
  0x5f   :  { %133 = shalt.err (!%p130_p1)
}
  0x60   :  { %66 = dma.vmem_to_hbm [thread:$0]  %s64_s18, 256, %s175_s1, [#allocation4]  }
  0x61   :  { %136 = dma.done.wait [#allocation4], 256  }
  0x62   :  { %137 = vsyncadd [#allocation4], 4294967040 }
  0x63   :  { %70 = vsyncpa [#allocation3], 1 }
  0x64   :  { %71 = vsyncpa [#allocation4], 1 }

</bundles_post_ra>
